<compile_context>
chip_gen: v6e
topology: v6e:2x2x1
jax: 0.10.0
libtpu: 0.0.40
codegen_flags: <defaults>
</compile_context>

<pallas_src>
import jax
import jax.numpy as jnp
from jax import lax
from jax.experimental import pallas as pl
from jax.experimental.pallas import tpu as pltpu

ALPHA = 1.0
BETA = 10.0
OHEM_RATIO = 3.0
EPS = 1e-6

# partial-sum slots (deduplicated: dice_gt_sum == pos_cnt; neg_cnt = mask_sum - pos_cnt)
_NQ = 7
(_POS_CNT, _MASK_SUM, _POS_LOSS, _L1_NUM, _L1_DEN, _DICE_INTER, _DICE_PRED) = range(_NQ)


def _make_kernel(H, TH):
    """Build the DBLoss tile kernel (closure over static H / row-tile size)."""
    has_tail = (H % TH) != 0
    n_h = pl.cdiv(H, TH)

    def tile_body(pred_ref, sgt_ref, smask_ref, tgt_ref, tmask_ref,
                  neg_ref, part_ref, row_valid):
        shrink = pred_ref[0, 0, :, :]                      # (TH, W) f32
        thr = pred_ref[0, 1, :, :]
        binp = pred_ref[0, 2, :, :]
        gt = sgt_ref[0].astype(jnp.float32)                # {0,1}, possibly bf16 input
        mask = smask_ref[0].astype(jnp.float32)
        t_gt = tgt_ref[0].astype(jnp.float32)
        t_mask = tmask_ref[0].astype(jnp.float32)

        if row_valid is not None:
            # Tail tile: sanitize padded (out-of-bounds) rows BEFORE any log /
            # arithmetic so garbage (possibly NaN) can never reach accumulators.
            zero = jnp.float32(0.0)
            shrink = jnp.where(row_valid, shrink, zero)
            thr = jnp.where(row_valid, thr, zero)
            binp = jnp.where(row_valid, binp, zero)
            gt = jnp.where(row_valid, gt, zero)
            mask = jnp.where(row_valid, mask, zero)
            t_gt = jnp.where(row_valid, t_gt, zero)
            t_mask = jnp.where(row_valid, t_mask, zero)

        th_rows, w = shrink.shape                          # static

        # ---- Balanced BCE: gt in {0,1} -> one select, one log, one clamp.
        # (torch BCE clamps the log at -100.)
        p_correct = jnp.where(gt > 0.5, shrink, 1.0 - shrink)
        bce = -jnp.maximum(jnp.log(p_correct), -100.0)

        positive = gt * mask
        pos_loss_e = bce * positive
        neg_loss_e = bce * mask - pos_loss_e               # == bce * (1 - gt) * mask

        neg_ref[0] = neg_loss_e                            # full map (needed for OHEM top-k)

        # ---- Masked L1 (threshold maps) & Dice (binary maps), elementwise.
        l1_e = jnp.abs(thr - t_gt) * t_mask
        dice_inter_e = binp * positive
        dice_pred_e = binp * mask

        # Per-tile partial reduce: fold 8-row sublane groups with elementwise
        # (VPU) vreg adds into an (8, W) partial per quantity.  No per-step
        # cross-lane (XLU) reduction; the final reduce happens in the wrapper.
        if th_rows % 8 == 0:
            def psum(x):
                return jnp.sum(x.reshape(th_rows // 8, 8, w), axis=0)      # (8, W)
        else:  # only possible when TH == H (full-H block with odd H)
            def psum(x):
                return jnp.sum(x, axis=0, keepdims=True)                   # (1, W)

        def accumulate(q, val):
            p = psum(val)
            r = p.shape[0]
            part_ref[0, q * 8:q * 8 + r, :] += p

        accumulate(_POS_CNT, positive)
        accumulate(_MASK_SUM, mask)
        accumulate(_POS_LOSS, pos_loss_e)
        accumulate(_L1_NUM, l1_e)
        accumulate(_L1_DEN, t_mask)
        accumulate(_DICE_INTER, dice_inter_e)
        accumulate(_DICE_PRED, dice_pred_e)

    def kernel(pred_ref, sgt_ref, smask_ref, tgt_ref, tmask_ref, neg_ref, part_ref):
        h = pl.program_id(1)

        # Zero the per-batch resident partial-sum block on the first H-tile.
        @pl.when(h == 0)
        def _():
            part_ref[...] = jnp.zeros_like(part_ref)

        if not has_tail:
            tile_body(pred_ref, sgt_ref, smask_ref, tgt_ref, tmask_ref,
                      neg_ref, part_ref, None)
        else:
            @pl.when(h < n_h - 1)
            def _():
                tile_body(pred_ref, sgt_ref, smask_ref, tgt_ref, tmask_ref,
                          neg_ref, part_ref, None)

            @pl.when(h == n_h - 1)
            def _():
                rows_left = H - (n_h - 1) * TH             # static Python int
                row_ids = lax.broadcasted_iota(jnp.int32, (TH, 1), 0)
                tile_body(pred_ref, sgt_ref, smask_ref, tgt_ref, tmask_ref,
                          neg_ref, part_ref, row_ids < rows_left)

    return kernel


def _hw_limits():
    """Per-TPU-generation (max row tile, scoped-VMEM cap in bytes)."""
    vmem_phys = 64 << 20                      # conservative (v7x-sized) fallback
    try:
        info = pltpu.get_tpu_info()
        vmem_phys = int(getattr(info, "vmem_capacity_bytes", vmem_phys))
    except Exception:
        pass
    if vmem_phys >= (100 << 20):              # v5e / v6e: 128 MiB physical VMEM
        return 512, 64 << 20
    return 256, 36 << 20                      # v7x (64 MiB physical) / unknown


def _pick_row_tile(h, max_rows):
    if h <= max_rows:
        return h          # full-H block: exempt from the multiple-of-8 rule
    return max_rows - (max_rows % 8)


def db_loss(pred, batch, alpha=ALPHA, beta=BETA, ohem_ratio=OHEM_RATIO, eps=EPS,
            row_tile=None, ohem_topk_cap=None):
    B, C, H, W = pred.shape
    assert C > 2, "this wrapper implements the 3-channel (binary-map) branch"

    sgt = batch["shrink_map"]
    smask = batch["shrink_mask"]
    tgt = batch["threshold_map"]
    tmask = batch["threshold_mask"]

    max_rows, vmem_cap = _hw_limits()
    if row_tile is not None:
        TH = min(int(row_tile), H)
        if TH < H:
            TH = max(8, TH - TH % 8)          # keep second-to-last block dim /8
    else:
        TH = _pick_row_tile(H, max_rows)
    n_h = pl.cdiv(H, TH)                      # tail tile (if any) masked in-kernel

    map_spec = pl.BlockSpec((1, TH, W), lambda b, h: (b, h, 0))
    out_shapes = (
        jax.ShapeDtypeStruct((B, H, W), jnp.float32),         # negative-loss map (OHEM)
        jax.ShapeDtypeStruct((B, _NQ * 8, W), jnp.float32),   # per-batch lane-shaped partials
    )
    out_specs = (
        map_spec,
        pl.BlockSpec((1, _NQ * 8, W), lambda b, h: (b, 0, 0)),  # resident across h
    )

    def _isz(a):
        return jnp.dtype(a.dtype).itemsize

    step_bytes = (
        C * TH * W * _isz(pred)
        + TH * W * (_isz(sgt) + _isz(smask) + _isz(tgt) + _isz(tmask))
        + TH * W * 4                      # neg-loss output tile
        + _NQ * 8 * W * 4                 # partials block
    )
    vmem_limit = int(min(max(4 * step_bytes + (4 << 20), 16 << 20), vmem_cap))

    neg_loss_map, partials = pl.pallas_call(
        _make_kernel(H, TH),
        out_shape=out_shapes,
        grid_spec=pltpu.PrefetchScalarGridSpec(
            num_scalar_prefetch=0,
            grid=(B, n_h),
            in_specs=[
                pl.BlockSpec((1, C, TH, W), lambda b, h: (b, 0, h, 0)),
                map_spec, map_spec, map_spec, map_spec,
            ],
            out_specs=out_specs,
        ),
        compiler_params=pltpu.CompilerParams(
            dimension_semantics=("parallel", "arbitrary"),
            vmem_limit_bytes=vmem_limit,
        ),
    )(pred, sgt, smask, tgt, tmask)

    # Single tiny cross-lane reduction over the partials.
    sums = jnp.sum(partials.reshape(B, _NQ, 8, W), axis=(0, 2, 3))
    pos_cnt = sums[_POS_CNT]
    mask_sum = sums[_MASK_SUM]
    pos_loss_sum = sums[_POS_LOSS]
    l1_num = sums[_L1_NUM]
    l1_den = sums[_L1_DEN]
    dice_inter = sums[_DICE_INTER]
    dice_pred_sum = sums[_DICE_PRED]
    neg_cnt_total = mask_sum - pos_cnt
    dice_gt_sum = pos_cnt

    # ---- OHEM selection (dynamic k). Fast path: capped lax.top_k; exact sort
    # fallback only when the dynamic neg count exceeds the static cap, so the
    # result matches the reference sort semantics exactly in all cases.
    neg_cnt = jnp.minimum(neg_cnt_total, jnp.floor(pos_cnt * ohem_ratio))

    neg_flat = neg_loss_map.reshape(-1)
    n_total = neg_flat.shape[0]
    if ohem_topk_cap is None:
        ohem_topk_cap = max(1, n_total // 8)
    k_cap = int(min(max(int(ohem_topk_cap), 1), n_total))

    def _topk_path(_):
        vals = lax.top_k(neg_flat, k_cap)[0]               # descending
        idx = jnp.arange(k_cap, dtype=jnp.float32)
        return jnp.sum(jnp.where(idx < neg_cnt, vals, 0.0))

    def _sort_path(_):
        desc = -jnp.sort(-neg_flat)
        idx = jnp.arange(n_total, dtype=jnp.float32)
        return jnp.sum(jnp.where(idx < neg_cnt, desc, 0.0))

    neg_topk_sum = lax.cond(neg_cnt <= jnp.float32(k_cap), _topk_path, _sort_path, None)

    loss_shrink_maps = (pos_loss_sum + neg_topk_sum) / (pos_cnt + neg_cnt + eps)
    loss_threshold_maps = l1_num / (l1_den + eps)
    loss_binary_maps = 1.0 - 2.0 * dice_inter / (dice_pred_sum + dice_gt_sum + eps)
    loss_all = alpha * loss_shrink_maps + beta * loss_threshold_maps + loss_binary_maps

    return dict(
        loss_shrink_maps=loss_shrink_maps,
        loss_threshold_maps=loss_threshold_maps,
        loss_binary_maps=loss_binary_maps,
        loss=loss_all,
    )


def db_loss_ref(pred, batch, alpha=ALPHA, beta=BETA, ohem_ratio=OHEM_RATIO, eps=EPS):
    """Pure-JAX reference (mirrors the PyTorch semantics) for verification."""
    shrink_pred = pred[:, 0]
    thr_pred = pred[:, 1]
    bin_pred = pred[:, 2]
    gt = batch["shrink_map"].astype(jnp.float32)
    mask = batch["shrink_mask"].astype(jnp.float32)
    t_gt = batch["threshold_map"].astype(jnp.float32)
    t_mask = batch["threshold_mask"].astype(jnp.float32)

    log_p = jnp.maximum(jnp.log(shrink_pred), -100.0)
    log_1mp = jnp.maximum(jnp.log(1.0 - shrink_pred), -100.0)
    bce = -(gt * log_p + (1.0 - gt) * log_1mp)
    positive = gt * mask
    negative = (1.0 - gt) * mask
    pos_cnt = jnp.sum(positive)
    neg_cnt = jnp.minimum(jnp.sum(negative), jnp.floor(pos_cnt * ohem_ratio))
    neg_flat = (bce * negative).reshape(-1)
    sorted_desc = -jnp.sort(-neg_flat)
    idx = jnp.arange(sorted_desc.shape[0], dtype=jnp.float32)
    neg_topk_sum = jnp.sum(jnp.where(idx < neg_cnt, sorted_desc, 0.0))
    loss_shrink = (jnp.sum(bce * positive) + neg_topk_sum) / (pos_cnt + neg_cnt + eps)

    loss_thr = jnp.sum(jnp.abs(thr_pred - t_gt) * t_mask) / (jnp.sum(t_mask) + eps)

    inter = jnp.sum(bin_pred * gt * mask)
    union = jnp.sum(bin_pred * mask) + jnp.sum(gt * mask) + eps
    loss_bin = 1.0 - 2.0 * inter / union

    return dict(
        loss_shrink_maps=loss_shrink,
        loss_threshold_maps=loss_thr,
        loss_binary_maps=loss_bin,
        loss=alpha * loss_shrink + beta * loss_thr + loss_bin,
    )


if __name__ == "__main__":
    def make_inputs(B, H, W, key):
        k1, k2, k3, k4, k5 = jax.random.split(key, 5)
        pred = jax.nn.sigmoid(jax.random.normal(k1, (B, 3, H, W), jnp.float32))
        # Binary {0,1} maps are passed as bfloat16 (exact) to cut HBM read traffic.
        shrink_map = (jax.random.uniform(k2, (B, H, W)) > 0.6).astype(jnp.bfloat16)
        shrink_mask = (jax.random.uniform(k3, (B, H, W)) > 0.1).astype(jnp.bfloat16)
        threshold_map = jax.random.uniform(k4, (B, H, W), minval=0.3, maxval=0.7).astype(jnp.float32)
        threshold_mask = (jax.random.uniform(k5, (B, H, W)) > 0.3).astype(jnp.bfloat16)
        batch = dict(shrink_map=shrink_map, shrink_mask=shrink_mask,
                     threshold_map=threshold_map, threshold_mask=threshold_mask)
        return pred, batch

    names = ("loss_shrink_maps", "loss_threshold_maps", "loss_binary_maps", "loss")

    # Case 1: evenly tiled (TH == H); dynamic neg count exceeds the top-k cap,
    # so the exact sort fallback branch runs.
    pred, batch = make_inputs(2, 16, 16, jax.random.PRNGKey(0))
    metrics = db_loss(pred, batch)
    jax.block_until_ready(metrics)
    ref = db_loss_ref(pred, batch)
    for n in names:
        assert abs(float(metrics[n]) - float(ref[n])) < 1e-4, (
            n, float(metrics[n]), float(ref[n]))

    # Case 2: H not a multiple of the row tile (exercises in-kernel tail
    # masking) and a large top-k cap so the lax.top_k fast path runs.
    pred2, batch2 = make_inputs(1, 24, 16, jax.random.PRNGKey(1))
    metrics2 = db_loss(pred2, batch2, row_tile=16, ohem_topk_cap=1 * 24 * 16)
    jax.block_until_ready(metrics2)
    ref2 = db_loss_ref(pred2, batch2)
    for n in names:
        assert abs(float(metrics2[n]) - float(ref2[n])) < 1e-4, (
            n, float(metrics2[n]), float(ref2[n]))

    print("KERNEL_OK")
</pallas_src>

<mosaic_0001>
module attributes {stable_mosaic.version = 11 : i64} {
  func.func @kernel(%arg0: i32, %arg1: i32, %arg2: memref<1x3x16x16xf32, #tpu.memory_space<vmem>>, %arg3: memref<1x16x16xbf16, #tpu.memory_space<vmem>>, %arg4: memref<1x16x16xbf16, #tpu.memory_space<vmem>>, %arg5: memref<1x16x16xf32, #tpu.memory_space<vmem>>, %arg6: memref<1x16x16xbf16, #tpu.memory_space<vmem>>, %arg7: memref<1x16x16xf32, #tpu.memory_space<vmem>>, %arg8: memref<1x56x16xf32, #tpu.memory_space<vmem>>) attributes {dimension_semantics = [#tpu.dimension_semantics<parallel>, #tpu.dimension_semantics<arbitrary>], iteration_bounds = array<i64: 2, 1>, scalar_prefetch = 0 : i64, scratch_operands = 0 : i64, tpu.core_type = #tpu.core_type<tc>, window_params = [{transform_indices = @transform_0, window_bounds = array<i64: 1, 3, 16, 16>}, {transform_indices = @transform_1, window_bounds = array<i64: 1, 16, 16>}, {transform_indices = @transform_2, window_bounds = array<i64: 1, 16, 16>}, {transform_indices = @transform_3, window_bounds = array<i64: 1, 16, 16>}, {transform_indices = @transform_4, window_bounds = array<i64: 1, 16, 16>}, {transform_indices = @transform_5, window_bounds = array<i64: 1, 16, 16>}, {transform_indices = @transform_6, window_bounds = array<i64: 1, 56, 16>}]} {
    %c0_i32 = arith.constant 0 : i32
    %0 = arith.cmpi eq, %arg1, %c0_i32 : i32
    %1 = arith.extui %0 : i1 to i32
    %c0_i32_0 = arith.constant 0 : i32
    %2 = arith.cmpi ne, %1, %c0_i32_0 : i32
    scf.if %2 {
      %cst_71 = arith.constant 0.000000e+00 : f32
      %98 = vector.broadcast %cst_71 : f32 to vector<1x56x16xf32>
      %c0_72 = arith.constant 0 : index
      %c0_73 = arith.constant 0 : index
      %c0_74 = arith.constant 0 : index
      %99 = vector.load %arg8[%c0_72, %c0_73, %c0_74] : memref<1x56x16xf32, #tpu.memory_space<vmem>>, vector<1x56x16xf32>
      tpu.vector_store %arg8[%c0_72, %c0_73, %c0_74], %98 {strides = array<i32>} : memref<1x56x16xf32, #tpu.memory_space<vmem>>, vector<1x56x16xf32>,
    } else {
    }
    %c0 = arith.constant 0 : index
    %c0_1 = arith.constant 0 : index
    %c0_2 = arith.constant 0 : index
    %c0_3 = arith.constant 0 : index
    %3 = vector.load %arg2[%c0, %c0_1, %c0_2, %c0_3] : memref<1x3x16x16xf32, #tpu.memory_space<vmem>>, vector<1x1x16x16xf32>
    %4 = vector.shape_cast %3 : vector<1x1x16x16xf32> to vector<16x16xf32>
    %c0_4 = arith.constant 0 : index
    %c1 = arith.constant 1 : index
    %c0_5 = arith.constant 0 : index
    %c0_6 = arith.constant 0 : index
    %5 = vector.load %arg2[%c0_4, %c1, %c0_5, %c0_6] : memref<1x3x16x16xf32, #tpu.memory_space<vmem>>, vector<1x1x16x16xf32>
    %6 = vector.shape_cast %5 : vector<1x1x16x16xf32> to vector<16x16xf32>
    %c0_7 = arith.constant 0 : index
    %c2 = arith.constant 2 : index
    %c0_8 = arith.constant 0 : index
    %c0_9 = arith.constant 0 : index
    %7 = vector.load %arg2[%c0_7, %c2, %c0_8, %c0_9] : memref<1x3x16x16xf32, #tpu.memory_space<vmem>>, vector<1x1x16x16xf32>
    %8 = vector.shape_cast %7 : vector<1x1x16x16xf32> to vector<16x16xf32>
    %c0_10 = arith.constant 0 : index
    %c0_11 = arith.constant 0 : index
    %c0_12 = arith.constant 0 : index
    %9 = vector.load %arg3[%c0_10, %c0_11, %c0_12] : memref<1x16x16xbf16, #tpu.memory_space<vmem>>, vector<1x16x16xbf16>
    %10 = vector.shape_cast %9 : vector<1x16x16xbf16> to vector<16x16xbf16>
    %11 = arith.extf %10 : vector<16x16xbf16> to vector<16x16xf32>
    %c0_13 = arith.constant 0 : index
    %c0_14 = arith.constant 0 : index
    %c0_15 = arith.constant 0 : index
    %12 = vector.load %arg4[%c0_13, %c0_14, %c0_15] : memref<1x16x16xbf16, #tpu.memory_space<vmem>>, vector<1x16x16xbf16>
    %13 = vector.shape_cast %12 : vector<1x16x16xbf16> to vector<16x16xbf16>
    %14 = arith.extf %13 : vector<16x16xbf16> to vector<16x16xf32>
    %c0_16 = arith.constant 0 : index
    %c0_17 = arith.constant 0 : index
    %c0_18 = arith.constant 0 : index
    %15 = vector.load %arg5[%c0_16, %c0_17, %c0_18] : memref<1x16x16xf32, #tpu.memory_space<vmem>>, vector<1x16x16xf32>
    %16 = vector.shape_cast %15 : vector<1x16x16xf32> to vector<16x16xf32>
    %c0_19 = arith.constant 0 : index
    %c0_20 = arith.constant 0 : index
    %c0_21 = arith.constant 0 : index
    %17 = vector.load %arg6[%c0_19, %c0_20, %c0_21] : memref<1x16x16xbf16, #tpu.memory_space<vmem>>, vector<1x16x16xbf16>
    %18 = vector.shape_cast %17 : vector<1x16x16xbf16> to vector<16x16xbf16>
    %19 = arith.extf %18 : vector<16x16xbf16> to vector<16x16xf32>
    %cst = arith.constant 5.000000e-01 : f32
    %20 = vector.broadcast %cst : f32 to vector<16x16xf32>
    %21 = arith.cmpf ogt, %11, %20 : vector<16x16xf32>
    %cst_22 = arith.constant 1.000000e+00 : f32
    %22 = vector.broadcast %cst_22 : f32 to vector<16x16xf32>
    %23 = arith.subf %22, %4 : vector<16x16xf32>
    %24 = arith.select %21, %4, %23 : vector<16x16xi1>, vector<16x16xf32>
    %25 = math.log %24 : vector<16x16xf32>
    %cst_23 = arith.constant -1.000000e+02 : f32
    %26 = vector.broadcast %cst_23 : f32 to vector<16x16xf32>
    %27 = arith.maximumf %25, %26 : vector<16x16xf32>
    %cst_24 = arith.constant 0.000000e+00 : f32
    %28 = vector.broadcast %cst_24 : f32 to vector<16x16xf32>
    %29 = arith.subf %28, %27 : vector<16x16xf32>
    %30 = arith.mulf %11, %14 : vector<16x16xf32>
    %31 = arith.mulf %29, %30 : vector<16x16xf32>
    %32 = arith.mulf %29, %14 : vector<16x16xf32>
    %33 = arith.subf %32, %31 : vector<16x16xf32>
    %c0_25 = arith.constant 0 : index
    %c0_26 = arith.constant 0 : index
    %c0_27 = arith.constant 0 : index
    %34 = vector.load %arg7[%c0_25, %c0_26, %c0_27] : memref<1x16x16xf32, #tpu.memory_space<vmem>>, vector<1x16x16xf32>
    %35 = vector.shape_cast %34 : vector<1x16x16xf32> to vector<16x16xf32>
    %36 = vector.shape_cast %33 : vector<16x16xf32> to vector<1x16x16xf32>
    tpu.vector_store %arg7[%c0_25, %c0_26, %c0_27], %36 {strides = array<i32>} : memref<1x16x16xf32, #tpu.memory_space<vmem>>, vector<1x16x16xf32>,
    %37 = arith.subf %6, %16 : vector<16x16xf32>
    %38 = math.absf %37 : vector<16x16xf32>
    %39 = arith.mulf %38, %19 : vector<16x16xf32>
    %40 = arith.mulf %8, %30 : vector<16x16xf32>
    %41 = arith.mulf %8, %14 : vector<16x16xf32>
    %42 = vector.shape_cast %30 : vector<16x16xf32> to vector<2x8x16xf32>
    %cst_28 = arith.constant dense<0.000000e+00> : vector<8x16xf32>
    %43 = vector.multi_reduction <add>, %42, %cst_28 [0] : vector<2x8x16xf32> to vector<8x16xf32>
    %c0_29 = arith.constant 0 : index
    %c0_30 = arith.constant 0 : index
    %c0_31 = arith.constant 0 : index
    %44 = vector.load %arg8[%c0_29, %c0_30, %c0_31] : memref<1x56x16xf32, #tpu.memory_space<vmem>>, vector<1x8x16xf32>
    %45 = vector.shape_cast %44 : vector<1x8x16xf32> to vector<8x16xf32>
    %46 = arith.addf %45, %43 : vector<8x16xf32>
    %c0_32 = arith.constant 0 : index
    %c0_33 = arith.constant 0 : index
    %c0_34 = arith.constant 0 : index
    %47 = vector.load %arg8[%c0_32, %c0_33, %c0_34] : memref<1x56x16xf32, #tpu.memory_space<vmem>>, vector<1x8x16xf32>
    %48 = vector.shape_cast %47 : vector<1x8x16xf32> to vector<8x16xf32>
    %49 = vector.shape_cast %46 : vector<8x16xf32> to vector<1x8x16xf32>
    tpu.vector_store %arg8[%c0_32, %c0_33, %c0_34], %49 {strides = array<i32>} : memref<1x56x16xf32, #tpu.memory_space<vmem>>, vector<1x8x16xf32>,
    %50 = vector.shape_cast %14 : vector<16x16xf32> to vector<2x8x16xf32>
    %cst_35 = arith.constant dense<0.000000e+00> : vector<8x16xf32>
    %51 = vector.multi_reduction <add>, %50, %cst_35 [0] : vector<2x8x16xf32> to vector<8x16xf32>
    %c0_36 = arith.constant 0 : index
    %c8 = arith.constant 8 : index
    %c0_37 = arith.constant 0 : index
    %52 = vector.load %arg8[%c0_36, %c8, %c0_37] : memref<1x56x16xf32, #tpu.memory_space<vmem>>, vector<1x8x16xf32>
    %53 = vector.shape_cast %52 : vector<1x8x16xf32> to vector<8x16xf32>
    %54 = arith.addf %53, %51 : vector<8x16xf32>
    %c0_38 = arith.constant 0 : index
    %c8_39 = arith.constant 8 : index
    %c0_40 = arith.constant 0 : index
    %55 = vector.load %arg8[%c0_38, %c8_39, %c0_40] : memref<1x56x16xf32, #tpu.memory_space<vmem>>, vector<1x8x16xf32>
    %56 = vector.shape_cast %55 : vector<1x8x16xf32> to vector<8x16xf32>
    %57 = vector.shape_cast %54 : vector<8x16xf32> to vector<1x8x16xf32>
    tpu.vector_store %arg8[%c0_38, %c8_39, %c0_40], %57 {strides = array<i32>} : memref<1x56x16xf32, #tpu.memory_space<vmem>>, vector<1x8x16xf32>,
    %58 = vector.shape_cast %31 : vector<16x16xf32> to vector<2x8x16xf32>
    %cst_41 = arith.constant dense<0.000000e+00> : vector<8x16xf32>
    %59 = vector.multi_reduction <add>, %58, %cst_41 [0] : vector<2x8x16xf32> to vector<8x16xf32>
    %c0_42 = arith.constant 0 : index
    %c16 = arith.constant 16 : index
    %c0_43 = arith.constant 0 : index
    %60 = vector.load %arg8[%c0_42, %c16, %c0_43] : memref<1x56x16xf32, #tpu.memory_space<vmem>>, vector<1x8x16xf32>
    %61 = vector.shape_cast %60 : vector<1x8x16xf32> to vector<8x16xf32>
    %62 = arith.addf %61, %59 : vector<8x16xf32>
    %c0_44 = arith.constant 0 : index
    %c16_45 = arith.constant 16 : index
    %c0_46 = arith.constant 0 : index
    %63 = vector.load %arg8[%c0_44, %c16_45, %c0_46] : memref<1x56x16xf32, #tpu.memory_space<vmem>>, vector<1x8x16xf32>
    %64 = vector.shape_cast %63 : vector<1x8x16xf32> to vector<8x16xf32>
    %65 = vector.shape_cast %62 : vector<8x16xf32> to vector<1x8x16xf32>
    tpu.vector_store %arg8[%c0_44, %c16_45, %c0_46], %65 {strides = array<i32>} : memref<1x56x16xf32, #tpu.memory_space<vmem>>, vector<1x8x16xf32>,
    %66 = vector.shape_cast %39 : vector<16x16xf32> to vector<2x8x16xf32>
    %cst_47 = arith.constant dense<0.000000e+00> : vector<8x16xf32>
    %67 = vector.multi_reduction <add>, %66, %cst_47 [0] : vector<2x8x16xf32> to vector<8x16xf32>
    %c0_48 = arith.constant 0 : index
    %c24 = arith.constant 24 : index
    %c0_49 = arith.constant 0 : index
    %68 = vector.load %arg8[%c0_48, %c24, %c0_49] : memref<1x56x16xf32, #tpu.memory_space<vmem>>, vector<1x8x16xf32>
    %69 = vector.shape_cast %68 : vector<1x8x16xf32> to vector<8x16xf32>
    %70 = arith.addf %69, %67 : vector<8x16xf32>
    %c0_50 = arith.constant 0 : index
    %c24_51 = arith.constant 24 : index
    %c0_52 = arith.constant 0 : index
    %71 = vector.load %arg8[%c0_50, %c24_51, %c0_52] : memref<1x56x16xf32, #tpu.memory_space<vmem>>, vector<1x8x16xf32>
    %72 = vector.shape_cast %71 : vector<1x8x16xf32> to vector<8x16xf32>
    %73 = vector.shape_cast %70 : vector<8x16xf32> to vector<1x8x16xf32>
    tpu.vector_store %arg8[%c0_50, %c24_51, %c0_52], %73 {strides = array<i32>} : memref<1x56x16xf32, #tpu.memory_space<vmem>>, vector<1x8x16xf32>,
    %74 = vector.shape_cast %19 : vector<16x16xf32> to vector<2x8x16xf32>
    %cst_53 = arith.constant dense<0.000000e+00> : vector<8x16xf32>
    %75 = vector.multi_reduction <add>, %74, %cst_53 [0] : vector<2x8x16xf32> to vector<8x16xf32>
    %c0_54 = arith.constant 0 : index
    %c32 = arith.constant 32 : index
    %c0_55 = arith.constant 0 : index
    %76 = vector.load %arg8[%c0_54, %c32, %c0_55] : memref<1x56x16xf32, #tpu.memory_space<vmem>>, vector<1x8x16xf32>
    %77 = vector.shape_cast %76 : vector<1x8x16xf32> to vector<8x16xf32>
    %78 = arith.addf %77, %75 : vector<8x16xf32>
    %c0_56 = arith.constant 0 : index
    %c32_57 = arith.constant 32 : index
    %c0_58 = arith.constant 0 : index
    %79 = vector.load %arg8[%c0_56, %c32_57, %c0_58] : memref<1x56x16xf32, #tpu.memory_space<vmem>>, vector<1x8x16xf32>
    %80 = vector.shape_cast %79 : vector<1x8x16xf32> to vector<8x16xf32>
    %81 = vector.shape_cast %78 : vector<8x16xf32> to vector<1x8x16xf32>
    tpu.vector_store %arg8[%c0_56, %c32_57, %c0_58], %81 {strides = array<i32>} : memref<1x56x16xf32, #tpu.memory_space<vmem>>, vector<1x8x16xf32>,
    %82 = vector.shape_cast %40 : vector<16x16xf32> to vector<2x8x16xf32>
    %cst_59 = arith.constant dense<0.000000e+00> : vector<8x16xf32>
    %83 = vector.multi_reduction <add>, %82, %cst_59 [0] : vector<2x8x16xf32> to vector<8x16xf32>
    %c0_60 = arith.constant 0 : index
    %c40 = arith.constant 40 : index
    %c0_61 = arith.constant 0 : index
    %84 = vector.load %arg8[%c0_60, %c40, %c0_61] : memref<1x56x16xf32, #tpu.memory_space<vmem>>, vector<1x8x16xf32>
    %85 = vector.shape_cast %84 : vector<1x8x16xf32> to vector<8x16xf32>
    %86 = arith.addf %85, %83 : vector<8x16xf32>
    %c0_62 = arith.constant 0 : index
    %c40_63 = arith.constant 40 : index
    %c0_64 = arith.constant 0 : index
    %87 = vector.load %arg8[%c0_62, %c40_63, %c0_64] : memref<1x56x16xf32, #tpu.memory_space<vmem>>, vector<1x8x16xf32>
    %88 = vector.shape_cast %87 : vector<1x8x16xf32> to vector<8x16xf32>
    %89 = vector.shape_cast %86 : vector<8x16xf32> to vector<1x8x16xf32>
    tpu.vector_store %arg8[%c0_62, %c40_63, %c0_64], %89 {strides = array<i32>} : memref<1x56x16xf32, #tpu.memory_space<vmem>>, vector<1x8x16xf32>,
    %90 = vector.shape_cast %41 : vector<16x16xf32> to vector<2x8x16xf32>
    %cst_65 = arith.constant dense<0.000000e+00> : vector<8x16xf32>
    %91 = vector.multi_reduction <add>, %90, %cst_65 [0] : vector<2x8x16xf32> to vector<8x16xf32>
    %c0_66 = arith.constant 0 : index
    %c48 = arith.constant 48 : index
    %c0_67 = arith.constant 0 : index
    %92 = vector.load %arg8[%c0_66, %c48, %c0_67] : memref<1x56x16xf32, #tpu.memory_space<vmem>>, vector<1x8x16xf32>
    %93 = vector.shape_cast %92 : vector<1x8x16xf32> to vector<8x16xf32>
    %94 = arith.addf %93, %91 : vector<8x16xf32>
    %c0_68 = arith.constant 0 : index
    %c48_69 = arith.constant 48 : index
    %c0_70 = arith.constant 0 : index
    %95 = vector.load %arg8[%c0_68, %c48_69, %c0_70] : memref<1x56x16xf32, #tpu.memory_space<vmem>>, vector<1x8x16xf32>
    %96 = vector.shape_cast %95 : vector<1x8x16xf32> to vector<8x16xf32>
    %97 = vector.shape_cast %94 : vector<8x16xf32> to vector<1x8x16xf32>
    tpu.vector_store %arg8[%c0_68, %c48_69, %c0_70], %97 {strides = array<i32>} : memref<1x56x16xf32, #tpu.memory_space<vmem>>, vector<1x8x16xf32>,
    return
  }
  func.func @transform_0(%arg0: i32, %arg1: i32) -> (i32, i32, i32, i32) {
    %c0_i32 = arith.constant 0 : i32
    %c0_i32_0 = arith.constant 0 : i32
    %c0_i32_1 = arith.constant 0 : i32
    return %arg0, %c0_i32, %arg1, %c0_i32_0 : i32, i32, i32, i32
  }
  func.func @transform_1(%arg0: i32, %arg1: i32) -> (i32, i32, i32) {
    %c0_i32 = arith.constant 0 : i32
    %c0_i32_0 = arith.constant 0 : i32
    return %arg0, %arg1, %c0_i32 : i32, i32, i32
  }
  func.func @transform_2(%arg0: i32, %arg1: i32) -> (i32, i32, i32) {
    %c0_i32 = arith.constant 0 : i32
    %c0_i32_0 = arith.constant 0 : i32
    return %arg0, %arg1, %c0_i32 : i32, i32, i32
  }
  func.func @transform_3(%arg0: i32, %arg1: i32) -> (i32, i32, i32) {
    %c0_i32 = arith.constant 0 : i32
    %c0_i32_0 = arith.constant 0 : i32
    return %arg0, %arg1, %c0_i32 : i32, i32, i32
  }
  func.func @transform_4(%arg0: i32, %arg1: i32) -> (i32, i32, i32) {
    %c0_i32 = arith.constant 0 : i32
    %c0_i32_0 = arith.constant 0 : i32
    return %arg0, %arg1, %c0_i32 : i32, i32, i32
  }
  func.func @transform_5(%arg0: i32, %arg1: i32) -> (i32, i32, i32) {
    %c0_i32 = arith.constant 0 : i32
    %c0_i32_0 = arith.constant 0 : i32
    return %arg0, %arg1, %c0_i32 : i32, i32, i32
  }
  func.func @transform_6(%arg0: i32, %arg1: i32) -> (i32, i32, i32) {
    %c0_i32 = arith.constant 0 : i32
    %c0_i32_0 = arith.constant 0 : i32
    %c0_i32_1 = arith.constant 0 : i32
    return %arg0, %c0_i32, %c0_i32_0 : i32, i32, i32
  }
}

</mosaic_0001>

<bundles_post_ra>
// kernel: tpu_custom_call.1
= control target key start
LH: loop header
LB: loop body
LE: loop exit
PB: predicated region body
PF: predicated region fallthrough
CT: control target
= control target key end

     0   :  { %s1598_s0 = inlined_call_operand.hbm [shape: f32[2,3,16,16], index: 0, kind: input, shape index: {}]   ;;  %s1599_s1 = inlined_call_operand.hbm [shape: bf16[2,16,16], index: 1, kind: input, shape index: {}]   ;;  %s1600_s2 = inlined_call_operand.hbm [shape: bf16[2,16,16], index: 2, kind: input, shape index: {}]   ;;  %s1601_s3 = inlined_call_operand.hbm [shape: f32[2,16,16], index: 3, kind: input, shape index: {}]   ;;  %s1602_s4 = inlined_call_operand.hbm [shape: bf16[2,16,16], index: 4, kind: input, shape index: {}]   ;;  %s1603_s5 = inlined_call_operand.hbm [shape: f32[2,16,16], index: 5, kind: output, shape index: {0}]   ;;  %s1604_s6 = inlined_call_operand.vmem [shape: f32[2,56,16], index: 6, kind: output, shape index: {1}]  }
   0x1   :  { %1623 = sst [smem:[#allocation26_spill]] %s1599_s1 }
   0x2   :  { %1624 = sst [smem:[#allocation27_spill]] %s1601_s3 }
   0x3   :  { %1625 = sst [smem:[#allocation28_spill]] %s1603_s5 }
   0x4   :  { %1626 = sst [smem:[#allocation29_spill]] %s1604_s6 }
   0x5   :  { %12 = vsyncpa [#allocation3], 0 }
   0x6   :  { %14 = vsyncpa [#allocation3 + $0x1], 0 }
   0x7   :  { %15 = vsyncpa [#allocation6], 0 }
   0x8   :  { %17 = vsyncpa [#allocation6 + $0x1], 0 }
   0x9   :  { %18 = vsyncpa [#allocation9], 0 }
   0xa   :  { %20 = vsyncpa [#allocation9 + $0x1], 0 }
   0xb   :  { %21 = vsyncpa [#allocation4], 0 }
   0xc   :  { %23 = vsyncpa [#allocation4 + $0x1], 0  ;;  %s1247_s21 = smov 0   ;;  %s1249_s22 = smov 0  }
   0xd   :  { %s1251_s23 = smov 0   ;;  %s1253_s24 = smov 0  }
   0xe   :  { %s1255_s25 = smov 0   ;;  %s1257_s26 = smov 0  }
   0xf LB: > { %1627 = sst [smem:[#allocation16_spill]] %s1177_s21  ;;  %s1278_s27 = sadd.s32 4294967295, %s1197_s26   ;;  %s1197_s26 = sphi %s1257_s26, %s29_s26   ;;  %s1193_s25 = sphi %s1255_s25, %s1665_s25   ;;  %s1189_s24 = sphi %s1253_s24, %s1664_s24   ;;  %s1185_s23 = sphi %s1251_s23, %s1660_s23   ;;  %s1181_s22 = sphi %s1249_s22, %s1663_s22   ;;  %s1177_s21 = sphi %s1247_s21, %s1662_s21  }
  0x10   : > { %1628 = sst [smem:[#allocation17_spill]] %s1185_s23  ;;  %s823_s28 = sadd.s32 4294967294, %s1197_s26  }
  0x11   : > { %1629 = sst [smem:[#allocation18_spill]] %s1189_s24  ;;  %s41_s29 = sadd.s32 1, %s1193_s25 }
  0x12   : > { %1630 = sst [smem:[#allocation19_spill]] %s1197_s26  ;;  %s50_s30 = sadd.s32 1, %s1185_s23 }
  0x13   : > { %1631 = sst [smem:[#allocation20_spill]] %s1278_s27  ;;  %p43_p0 = scmp.ge.s32.totalorder %s41_s29, 2 }
  0x14   : > { %p57_p1 = scmp.ne.s32.totalorder %s1185_s23, %s1181_s22  ;;  %p58_p2 = scmp.eq.s32.totalorder %s1197_s26, 0 }
  0x15   : > { %p63_p3 = scmp.ne.s32.totalorder %s1181_s22, %s1177_s21  ;;  %s1667_s29 = smov (%p43_p0, %s41_s29), 0 }
  0x16   : > { %1632 = sst [smem:[#allocation21_spill]] %s1667_s29  ;;  %p1290_p4 = por %p58_p2, %p57_p1 }
  0x17   : > { %p64_p5 = scmp.eq.s32.totalorder %s1278_s27, 0  ;;  %s45_s8 = ssub.s32 %s1193_s25, %s1667_s29 }
  0x18   : > { %p201_p6 = scmp.eq.s32.totalorder %s1278_s27, 1  ;;  %p48_p7 = scmp.eq.s32.totalorder %s45_s8, 0 }
  0x19   : > { %p1298_p8 = por %p64_p5, %p63_p3  ;;  %p207_p10 = scmp.eq.s32.totalorder %s823_s28, 1 }
  0x1a   : > { %p1302_p9 = por %p201_p6, %p57_p1  ;;  %p908_p13 = scmp.lt.s32.totalorder %s1197_s26, 2 }
  0x1b   : > { %s1634_s9 = scalar_select %p1298_p8, 1, 0 }
  0x1c   : > { %s1636_s10 = scalar_select %p1302_p9, 1, 0 }
  0x1d   : > { %1635 = sst [smem:[#allocation22_spill]] %s1634_s9  ;;  %p1309_p11 = por %p207_p10, %p63_p3 }
  0x1e   : > { %1637 = sst [smem:[#allocation23_spill]] %s1636_s10  ;;  %s1316_s13 = sand.u32 1, %s1185_s23  }
  0x1f   : > { %s1307_s11 = scalar_select %p48_p7, %s1185_s23, %s50_s30  }
  0x20   : > { %s1639_s12 = scalar_select %p1309_p11, 1, 0 }
  0x21   : > { %1638 = sst [smem:[#allocation24_spill]] %s1307_s11  ;;  %s1606_s14 = sand.u32 1, %s1197_s26  }
  0x22   : > { %1640 = sst [smem:[#allocation25_spill]] %s1639_s12  ;;  %s1320_s15 = sshll.u32 %s1316_s13, 3 }
  0x23   : > { %p1324_p0 = pnand %p908_p13, %p1290_p4  ;;  %s1329_s17 = sshll.u32 %s1193_s25, 7 }
  0x24   : > { %s1642_s1 = sld [smem:[#allocation26_spill]]  ;;  %s280_s28 = scalar_lea.vmem [#allocation5], %s1320_s15 }
  0x25   : > { %s289_s30 = sshll.u32 %s280_s28, 4  ;;  %s1338_s8 = scalar_lea.sflag [#allocation6], %s1606_s14  ;;  %s290_s30 = int_to_ptr.vmem [resolvable:$true] %s289_s30 }
  0x26   : > { %p1342_p1 = pneg %p1324_p0  ;;  %s982_s29 = scalar_lea.vmem %s290_s30, 128 }
  0x27   : > { %p983_p2 = scmp.ne.s32.totalorder %s290_s30, %s982_s29  ;;  %s1199_s11 = smov [#allocation5]  }
  0x28   : > { %s987_s18 = sshll.u32 %s1199_s11, 4  ;;  %s988_s18 = int_to_ptr.vmem [resolvable:$false] %s987_s18 }
  0x29   : > { %p985_p3 = pnand %p983_p2, %p1342_p1  ;;  %s989_s19 = scalar_lea.vmem %s988_s18, 256 }
  0x2a   : > { %s288_s20 = scalar_lea.hbm %s1642_s1, %s1329_s17  ;;  %p990_p5 = scmp.lt.s32.totalorder %s290_s30, %s988_s18 }
  0x2b   : > { %p986_p4 = pneg %p985_p3  ;;  %p991_p6 = scmp.lt.s32.totalorder %s989_s19, %s982_s29 }
  0x2d   : > { %p992_p7 = por %p991_p6, %p990_p5 }
  0x2f   : > { %p993_p10 = pnand %p992_p7, %p986_p4 }
  0x31   : > { %996 = shalt.err (!%p993_p10)
}
  0x32   : > { %s1613_s28 = smov 64   ;;  %s1615_s14 = smov 4  }
  0x33   : > { %894 = dma.hbm_to_vmem [thread:$0]  (!%p1324_p0), %s288_s20, 128, %s290_s30, %s1338_s8, %s1613_s28, %s1613_s28, %s1615_s14  }
  0x34   : > { %p839_p13 = scmp.ge.s32.totalorder %s1197_s26, 1  ;;  %p366_p2 = scmp.lt.s32.totalorder %s1197_s26, 3 }
  0x35   : > { %s833_s11 = sshll.u32 %s1316_s13, 4  ;;  %s857_s18 = sshll.u32 %s1193_s25, 8 }
  0x36   : > { %p1356_p3 = pnand %p839_p13, %p366_p2  ;;  %s1645_s3 = sld [smem:[#allocation27_spill]] }
  0x37   : > { %s326_s12 = scalar_lea.vmem [#allocation8], %s833_s11  ;;  %s1646_s5 = sand.u32 1, %s1197_s26  }
  0x38   : > { %s335_s21 = sshll.u32 %s326_s12, 4  ;;  %s1367_s10 = scalar_lea.sflag [#allocation9], %s1646_s5  ;;  %s336_s21 = int_to_ptr.vmem [resolvable:$true] %s335_s21 }
  0x39   : > { %s1010_s6 = scalar_lea.vmem %s336_s21, 256  ;;  %s1202_s20 = smov [#allocation8]  }
  0x3a   : > { %p1011_p4 = scmp.ne.s32.totalorder %s336_s21, %s1010_s6  ;;  %s1015_s30 = sshll.u32 %s1202_s20, 4  ;;  %s1016_s30 = int_to_ptr.vmem [resolvable:$false] %s1015_s30 }
  0x3b   : > { %s1017_s28 = scalar_lea.vmem %s1016_s30, 512  ;;  %p1018_p7 = scmp.lt.s32.totalorder %s336_s21, %s1016_s30 }
  0x3c   : > { %s334_s23 = scalar_lea.hbm %s1645_s3, %s857_s18  ;;  %p1013_p5 = pnand %p1011_p4, %p1342_p1 }
  0x3d   : > { %p1019_p10 = scmp.lt.s32.totalorder %s1017_s28, %s1010_s6 }
  0x3e   : > { %p1014_p6 = pneg %p1013_p5 }
  0x3f   : > { %p1020_p13 = por %p1019_p10, %p1018_p7 }
  0x41   : > { %p1021_p2 = pnand %p1020_p13, %p1014_p6 }
  0x43   : > { %1024 = shalt.err (!%p1021_p2)
}
  0x44   : > { %s1203_s1 = smov 128   ;;  %s1204_s5 = smov 8  }
  0x45   : > { %900 = dma.hbm_to_vmem [thread:$0]  (!%p1324_p0), %s334_s23, 256, %s336_s21, %s1367_s10, %s1203_s1, %s1203_s1, %s1204_s5  }
  0x46   : > { %s872_s12 = smul.u32 48, %s1316_s13  ;;  %s311_s18 = scalar_lea.hbm %s1600_s2, %s1329_s17 }
  0x47   : > { %s873_s6 = smul.u32 768, %s1193_s25  ;;  %s303_s26 = scalar_lea.vmem [#allocation7], %s1320_s15 }
  0x48   : > { %s257_s14 = scalar_lea.vmem [#allocation2], %s872_s12  ;;  %s312_s24 = sshll.u32 %s303_s26, 4  ;;  %s313_s24 = int_to_ptr.vmem [resolvable:$true] %s312_s24 }
  0x49   : > { %s265_s30 = scalar_lea.hbm %s1598_s0, %s873_s6  ;;  %s266_s3 = sshll.u32 %s257_s14, 4  ;;  %s267_s3 = int_to_ptr.vmem [resolvable:$true] %s266_s3 }
  0x4a   : > { %s254_s27 = scalar_lea.sflag [#allocation3], %s1316_s13  ;;  %s1038_s9 = scalar_lea.vmem %s267_s3, 768 }
  0x4b   : > { %p1039_p4 = scmp.ne.s32.totalorder %s267_s3, %s1038_s9  ;;  %s1205_s21 = smov [#allocation2]  }
  0x4c   : > { %s1043_s23 = sshll.u32 %s1205_s21, 4  ;;  %s1044_s23 = int_to_ptr.vmem [resolvable:$false] %s1043_s23 }
  0x4d   : > { %p1041_p5 = pnand %p1039_p4, %p1342_p1  ;;  %s1045_s28 = scalar_lea.vmem %s1044_s23, 1536 }
  0x4e   : > { %p1046_p7 = scmp.lt.s32.totalorder %s267_s3, %s1044_s23  ;;  %p1047_p10 = scmp.lt.s32.totalorder %s1045_s28, %s1038_s9 }
  0x4f   : > { %p1042_p6 = pneg %p1041_p5 }
  0x50   : > { %p1048_p13 = por %p1047_p10, %p1046_p7 }
  0x52   : > { %p1049_p2 = pnand %p1048_p13, %p1042_p6 }
  0x54   : > { %1052 = shalt.err (!%p1049_p2)
}
  0x55   : > { %891 = dma.hbm_to_vmem [thread:$0]  (!%p1324_p0), %s265_s30, 768, %s267_s3, %s254_s27, %s1203_s1, %s1203_s1, %s1204_s5  }
  0x56   : > { %s1066_s26 = scalar_lea.vmem %s313_s24, 128  ;;  %s1206_s13 = smov [#allocation7]  }
  0x57   : > { %p1067_p4 = scmp.ne.s32.totalorder %s313_s24, %s1066_s26  ;;  %s1071_s14 = sshll.u32 %s1206_s13, 4  ;;  %s1072_s14 = int_to_ptr.vmem [resolvable:$false] %s1071_s14 }
  0x58   : > { %s1073_s9 = scalar_lea.vmem %s1072_s14, 256  ;;  %p1074_p7 = scmp.lt.s32.totalorder %s313_s24, %s1072_s14 }
  0x59   : > { %p1069_p5 = pnand %p1067_p4, %p1342_p1  ;;  %p1075_p6 = scmp.lt.s32.totalorder %s1073_s9, %s1066_s26 }
  0x5b   : > { %p1070_p12 = pneg %p1069_p5  ;;  %p1076_p10 = por %p1075_p6, %p1074_p7 }
  0x5d   : > { %p1077_p13 = pnand %p1076_p10, %p1070_p12 }
  0x5f   : > { %1080 = shalt.err (!%p1077_p13)
}
  0x60   : > { %s1647_s12 = smov 4   ;;  %s1648_s6 = smov 64  }
  0x61   : > { %897 = dma.hbm_to_vmem [thread:$0]  (!%p1324_p0), %s311_s18, 128, %s313_s24, %s1338_s8, %s1648_s6, %s1648_s6, %s1647_s12  }
  0x62   : > { %s357_s11 = scalar_lea.hbm %s1602_s4, %s1329_s17  ;;  %s349_s19 = scalar_lea.vmem [#allocation10], %s1320_s15 }
  0x63   : > { %s358_s20 = sshll.u32 %s349_s19, 4  ;;  %s1207_s21 = smov [#allocation10]   ;;  %s359_s20 = int_to_ptr.vmem [resolvable:$true] %s358_s20 }
  0x64   : > { %s1094_s30 = scalar_lea.vmem %s359_s20, 128  ;;  %s1099_s23 = sshll.u32 %s1207_s21, 4  ;;  %s1100_s23 = int_to_ptr.vmem [resolvable:$false] %s1099_s23 }
  0x65   : > { %p1095_p12 = scmp.ne.s32.totalorder %s359_s20, %s1094_s30  ;;  %s1101_s28 = scalar_lea.vmem %s1100_s23, 256 }
  0x66   : > { %p1102_p5 = scmp.lt.s32.totalorder %s359_s20, %s1100_s23  ;;  %p1103_p7 = scmp.lt.s32.totalorder %s1101_s28, %s1094_s30 }
  0x67   : > { %p1097_p2 = pnand %p1095_p12, %p1342_p1 }
  0x68   : > { %p1104_p6 = por %p1103_p7, %p1102_p5 }
  0x69   : > { %p1098_p4 = pneg %p1097_p2 }
  0x6b   : > { %p1105_p10 = pnand %p1104_p6, %p1098_p4 }
  0x6d   : > { %1108 = shalt.err (!%p1105_p10)
}
  0x6e   : > { %903 = dma.hbm_to_vmem [thread:$0]  (!%p1324_p0), %s357_s11, 128, %s359_s20, %s1367_s10, %s1648_s6, %s1648_s6, %s1647_s12  }
  0x6f   : > { %370 = sbr.rel (%p1356_p3) target bundleno = 175 (0xaf), region = 40  ;;  %s1424_s15 = sand.u32 (!%p1356_p3), 1, %s1181_s22  }
  0x70   : > { %s874_s17 = smul.u32 (!%p1356_p3), 48, %s1424_s15  ;;  %s373_s8 = scalar_lea.sflag (!%p1356_p3), [#allocation3], %s1424_s15 }
  0x72   : > { %s1428_s7 = scalar_lea.vmem (!%p1356_p3), [#allocation2], %s874_s17 }
  0x74   : > { %1160 = dma.done.wait (%p1298_p8), %s373_s8, 768  }
  0x75   : > { %1162 = vsyncadd (%p1298_p8), %s373_s8, 4294966528  ;;  %s1650_s16 = sld [smem:[#allocation20_spill]]  ;;  %s1436_s29 = sshll.u32 %s1424_s15, 3 }
  0x76   : > { %s385_s26 = scalar_lea.vmem [#allocation5], %s1436_s29 }
  0x7b   : > { %s381_s10 = sand.u32 1, %s1650_s16  }
  0x7c   : > { %s382_s18 = scalar_lea.sflag [#allocation6], %s381_s10 }
  0x7d   : > { %1164 = dma.done.wait (%p1298_p8), %s382_s18, 256  }
  0x7e   : > { %1166 = vsyncadd (%p1298_p8), %s382_s18, 4294967040  ;;  %s842_s13 = sshll.u32 %s1424_s15, 4  ;;  %s394_s14 = scalar_lea.vmem [#allocation7], %s1436_s29 }
  0x7f   : > { %s400_s9 = scalar_lea.sflag [#allocation9], %s381_s10  ;;  %s1447_s12 = scalar_lea.vmem [#allocation8], %s842_s13 }
  0x80   : > { %1168 = dma.done.wait (%p1298_p8), %s400_s9, 384  }
  0x81   : > { %1170 = vsyncadd (%p1298_p8), %s400_s9, 4294966912  ;;  %s1651_s6 = sld [smem:[#allocation18_spill]]  ;;  %vm481_vm0 = vcmask 130048   ;;  %v1208_v0 = vmov 0.0   ;;  %v489_v1 = vld [vmem:[%s1428_s7] sm:$0xff]  ;;  %v865_v3 = vld [vmem:[%s394_s14] sm:$0xff]  }
  0x82   : > { %s1652_s11 = sld [smem:[#allocation29_spill]]  ;;  %v861_v2 = vld [vmem:[%s385_s26] sm:$0xff]   ;;  %v1475_v5 = vunpack.c.l.bf16 %v865_v3  ;;  %v513_v6 = vsub.f32 1.0, %v489_v1  ;;  %v490_v7 = vld [vmem:[%s1428_s7 + $0x8] sm:$0xff]  ;;  %v1478_v9 = vunpack.c.h.bf16 %v865_v3  ;;  %s412_s20 = scalar_lea.vmem [#allocation10], %s1436_s29  ;;  %v846_v14 = vld [vmem:[%s1428_s7 + $0x10] sm:$0xff] }
  0x83   : > { %v862_v4 = vunpack.c.l.bf16 %v861_v2  ;;  %v863_v8 = vunpack.c.h.bf16 %v861_v2  ;;  %v514_v10 = vsub.f32 1.0, %v490_v7  ;;  %v869_v11 = vld [vmem:[%s412_s20] sm:$0xff]   ;;  %v506_v21 = vld [vmem:[%s1447_s12 + $0x8] sm:$0xff]  ;;  %s458_s30 = scalar_lea.vmem [#allocation11], %s842_s13  ;;  %s1654_s8 = sld [smem:[#allocation28_spill]] }
  0x84   : > { %v552_v13 = vsel %vm481_vm0, %v1475_v5, 0.0  ;;  %v505_v15 = vld [vmem:[%s1447_s12] sm:$0xff]  ;;  %v553_v19 = vsel %vm481_vm0, %v1478_v9, 0.0  ;;  %v847_v20 = vld [vmem:[%s1428_s7 + $0x18] sm:$0xff]  ;;  %v870_v25 = vunpack.c.l.bf16 %v869_v11  ;;  %v849_v26 = vld [vmem:[%s1428_s7 + $0x28] sm:$0xff]  ;;  %v871_v28 = vunpack.c.h.bf16 %v869_v11  ;;  %s609_s21 = sshll.u32 %s458_s30, 4  ;;  %s1536_s21 = int_to_ptr.vmem [resolvable:$true] %s609_s21 }
  0x85   : > { %vm511_vm1 = vcmp.gt.f32.partialorder %v862_v4, 0.5  ;;  %v1482_v12 = vmul.f32 %v1475_v5, %v862_v4  ;;  %vm512_vm2 = vcmp.gt.f32.partialorder %v863_v8, 0.5  ;;  %v1489_v18 = vmul.f32 %v1478_v9, %v863_v8  ;;  %v848_v22 = vld [vmem:[%s1428_s7 + $0x20] sm:$0xff]  ;;  %s589_s16 = scalar_lea.sflag [#allocation4], %s1424_s15  ;;  %s1109_s10 = scalar_lea.vmem %s1536_s21, 256 }
  0x86   : > { %v515_v16 = vsel %vm511_vm1, %v489_v1, %v513_v6  ;;  %v516_v17 = vsel %vm512_vm2, %v490_v7, %v514_v10  ;;  %v554_v24 = vadd.f32 %v553_v19, %v552_v13  ;;  %v536_v29 = vsub.f32 %v846_v14, %v505_v15  ;;  %p1110_p8 = scmp.ne.s32.totalorder %s1536_s21, %s1109_s10  ;;  %s1209_s29 = smov [#allocation11]  }
  0x87   : > { %p472_p0 = scmp.lt.s32.totalorder %s1651_s6, 1  ;;  %965 = vlog2.f32 %v515_v16  ;;  %v546_v23 = vsel %vm481_vm0, %v1482_v12, 0.0  ;;  %v547_v27 = vsel %vm481_vm0, %v1489_v18, 0.0  ;;  %v537_v33 = vsub.f32 %v847_v20, %v506_v21  ;;  %s859_s23 = sshll.u32 %s1651_s6, 8 }
  0x88   : > { %967 = vlog2.f32 %v516_v17  ;;  %v548_v30 = vadd.f32 %v547_v27, %v546_v23  ;;  %v570_v34 = vsel %vm481_vm0, %v870_v25, 0.0  ;;  %v542_v35 = vmul.f32 %v848_v22, %v1482_v12  ;;  %p1111_p1 = pnand %p1110_p8, %p1302_p9  ;;  %s1113_s18 = sshll.u32 %s1209_s29, 4  ;;  %s1114_s18 = int_to_ptr.vmem [resolvable:$false] %s1113_s18 }
  0x89   : > { %s473_s3 = scalar_select %p472_p0, %s1651_s6, 1  ;;  %v538_v37 = vand.u32 2147483647, %v536_v29  ;;  %v571_v38 = vsel %vm481_vm0, %v871_v28, 0.0  ;;  %v543_v40 = vmul.f32 %v849_v26, %v1489_v18  ;;  %v539_v42 = vand.u32 2147483647, %v537_v33 }
  0x8a   : > { %v572_v43 = vadd.f32 %v571_v38, %v570_v34  ;;  %v576_v44 = vsel %vm481_vm0, %v542_v35, 0.0  ;;  %v544_v48 = vmul.f32 %v1475_v5, %v848_v22  ;;  %v545_v49 = vmul.f32 %v1478_v9, %v849_v26  ;;  %s1544_s7 = scalar_lea.hbm %s1654_s8, %s859_s23  ;;  %p1112_p3 = pneg %p1111_p1 }
  0x8b   : > { %s875_s27 = smul.u32 56, %s473_s3  ;;  %v540_v45 = vmul.f32 %v870_v25, %v538_v37  ;;  %v577_v46 = vsel %vm481_vm0, %v543_v40, 0.0  ;;  %v541_v50 = vmul.f32 %v871_v28, %v539_v42  ;;  %s1115_s26 = scalar_lea.vmem %s1114_s18, 512 }
  0x8c   : > { %v578_v52 = vadd.f32 %v577_v46, %v576_v44  ;;  %v582_v54 = vsel %vm481_vm0, %v544_v48, 0.0  ;;  %v583_v55 = vsel %vm481_vm0, %v545_v49, 0.0  ;;  %p1116_p13 = scmp.lt.s32.totalorder %s1536_s21, %s1114_s18  ;;  %p1117_p12 = scmp.lt.s32.totalorder %s1115_s26, %s1109_s10 }
  0x8d   : > { %s1458_s19 = scalar_lea.vmem %s1652_s11, %s875_s27  ;;  %v564_v53 = vsel %vm481_vm0, %v540_v45, 0.0  ;;  %v565_v57 = vsel %vm481_vm0, %v541_v50, 0.0  ;;  %v584_v60 = vadd.f32 %v583_v55, %v582_v54 }
  0x8e   : > { %482 = vst.msk [vmem:[%s1458_s19] sm:$0xff] %vm481_vm0, %v1208_v0  ;;  %483 = vst.msk [vmem:[%s1458_s19 + $0x8] sm:$0xff] %vm481_vm0, %v1208_v0  ;;  %v566_v61 = vadd.f32 %v565_v57, %v564_v53  ;;  %p1118_p2 = por %p1117_p12, %p1116_p13 }
  0x8f   : > { %484 = vst.msk [vmem:[%s1458_s19 + $0x10] sm:$0xff] %vm481_vm0, %v1208_v0  ;;  %485 = vst.msk [vmem:[%s1458_s19 + $0x18] sm:$0xff] %vm481_vm0, %v1208_v0 }
  0x90   : > { %486 = vst.msk [vmem:[%s1458_s19 + $0x20] sm:$0xff] %vm481_vm0, %v1208_v0  ;;  %487 = vst.msk [vmem:[%s1458_s19 + $0x28] sm:$0xff] %vm481_vm0, %v1208_v0  ;;  %p1119_p4 = pnand %p1118_p2, %p1112_p3 }
  0x91   : > { %488 = vst.msk [vmem:[%s1458_s19 + $0x30] sm:$0xff] %vm481_vm0, %v1208_v0 }
  0x94   : > { %v966_v0 = vpop.eup %965 }
  0x95   : > { %v549_v31 = vld [vmem:[%s1458_s19] sm:$0xff]  ;;  %v555_v32 = vld [vmem:[%s1458_s19 + $0x8] sm:$0xff]  ;;  %v968_v1 = vpop.eup %967  ;;  %v518_v2 = vmul.f32 0.6931472, %v966_v0 }
  0x96   : > { %v556_v36 = vadd.f32 %v555_v32, %v554_v24  ;;  %v550_v41 = vadd.f32 %v549_v31, %v548_v30  ;;  %v567_v58 = vld [vmem:[%s1458_s19 + $0x18] sm:$0xff]  ;;  %v520_v3 = vmul.f32 0.6931472, %v968_v1  ;;  %v561_v17 = vld [vmem:[%s1458_s19 + $0x10] sm:$0xff] }
  0x97   : > { %v573_v39 = vld [vmem:[%s1458_s19 + $0x20] sm:$0xff]  ;;  %v579_v47 = vld [vmem:[%s1458_s19 + $0x28] sm:$0xff]  ;;  %v568_v63 = vadd.f32 %v567_v58, %v566_v61  ;;  %v521_v4 = vmax.f32 %v518_v2, -100.0 }
  0x98   : > { %557 = vst.msk [vmem:[%s1458_s19 + $0x8] sm:$0xff] %vm481_vm0, %v556_v36  ;;  %551 = vst.msk [vmem:[%s1458_s19] sm:$0xff] %vm481_vm0, %v550_v41  ;;  %v574_v51 = vadd.f32 %v573_v39, %v572_v43  ;;  %v585_v56 = vld [vmem:[%s1458_s19 + $0x30] sm:$0xff]  ;;  %v580_v59 = vadd.f32 %v579_v47, %v578_v52  ;;  %v522_v6 = vmax.f32 %v520_v3, -100.0 }
  0x99   : > { %v586_v62 = vadd.f32 %v585_v56, %v584_v60  ;;  %569 = vst.msk [vmem:[%s1458_s19 + $0x18] sm:$0xff] %vm481_vm0, %v568_v63  ;;  %v523_v7 = vsub.f32 0.0, %v521_v4 }
  0x9a   : > { %575 = vst.msk [vmem:[%s1458_s19 + $0x20] sm:$0xff] %vm481_vm0, %v574_v51  ;;  %581 = vst.msk [vmem:[%s1458_s19 + $0x28] sm:$0xff] %vm481_vm0, %v580_v59  ;;  %v524_v8 = vsub.f32 0.0, %v522_v6 }
  0x9b   : > { %587 = vst.msk [vmem:[%s1458_s19 + $0x30] sm:$0xff] %vm481_vm0, %v586_v62  ;;  %v527_v10 = vmul.f32 %v1482_v12, %v523_v7  ;;  %v529_v11 = vmul.f32 %v1475_v5, %v523_v7 }
  0x9c   : > { %v528_v13 = vmul.f32 %v1489_v18, %v524_v8  ;;  %v530_v14 = vmul.f32 %v1478_v9, %v524_v8 }
  0x9d   : > { %v531_v15 = vsub.f32 %v529_v11, %v527_v10  ;;  %v558_v16 = vsel %vm481_vm0, %v527_v10, 0.0 }
  0x9e   : > { %v532_v12 = vsub.f32 %v530_v14, %v528_v13  ;;  %v559_v5 = vsel %vm481_vm0, %v528_v13, 0.0 }
  0x9f   : > { %534 = vst.msk [vmem:[%s458_s30] sm:$0xff] %vm481_vm0, %v531_v15  ;;  %v560_v19 = vadd.f32 %v559_v5, %v558_v16 }
  0xa0   : > { %535 = vst.msk [vmem:[%s458_s30 + $0x8] sm:$0xff] %vm481_vm0, %v532_v12 }
  0xa1   : > { %v562_v18 = vadd.f32 %v561_v17, %v560_v19 }
  0xa2   : > { %1122 = shalt.err (!%p1119_p4)
}
  0xa3   : > { %s1123_s13 = scalar_lea.hbm %s1544_s7, 256  ;;  %s1127_s12 = scalar_lea.hbm %s1654_s8, 512 }
  0xa4   : > { %p1124_p5 = scmp.ne.s32.totalorder %s1544_s7, %s1123_s13  ;;  %p1128_p10 = scmp.lt.s32.totalorder %s1544_s7, %s1654_s8 }
  0xa5   : > { %p1129_p0 = scmp.lt.s32.totalorder %s1127_s12, %s1123_s13 }
  0xa6   : > { %p1125_p7 = pnand %p1124_p5, %p1302_p9 }
  0xa7   : > { %p1130_p8 = por %p1129_p0, %p1128_p10 }
  0xa8   : > { %p1126_p6 = pneg %p1125_p7 }
  0xaa   : > { %p1131_p1 = pnand %p1130_p8, %p1126_p6 }
  0xac   : > { %1134 = shalt.err (!%p1131_p1)
}
  0xad   : > { %s1210_s27 = smov 128   ;;  %s1211_s1 = smov 8   ;;  %563 = vst.msk [vmem:[%s1458_s19 + $0x10] sm:$0xff] %vm481_vm0, %v562_v18 }
  0xae   : > { %886 = dma.vmem_to_hbm [thread:$0]  (%p1302_p9), %s1536_s21, 256, %s1544_s7, %s589_s16, %s1210_s27, %s1210_s27, %s1211_s1  }
  0xaf PF: > { %s1655_s5 = sld [smem:[#allocation16_spill]] }
  0xb0   : > { %s1657_s20 = sld [smem:[#allocation19_spill]] }
  0xb5   : > { %s627_s30 = sand.u32 1, %s1655_s5  }
  0xb6   : > { %p1658_p3 = scmp.ge.s32.totalorder %s1657_s20, 2  ;;  %s628_s23 = scalar_lea.sflag [#allocation4], %s627_s30 }
  0xb8   : > { %p905_p13 = pnand %p1658_p3, %p1309_p11 }
  0xba   : > { %p906_p12 = pneg %p905_p13 }
  0xbc   : > { %1172 = dma.done.wait (%p906_p12), %s628_s23, 256  }
  0xbd   : > { %1174 = vsyncadd (%p906_p12), %s628_s23, 4294967040  ;;  %s29_s26 = sadd.s32 1, %s1657_s20   ;;  %s1659_s15 = sld [smem:[#allocation17_spill]] }
  0xbe   : > { %p26_p2 = scmp.ge.s32.totalorder %s29_s26, 4   ;;  %s1660_s23 = sld [smem:[#allocation24_spill]] }
  0xbf   : > { %s1661_s19 = sld [smem:[#allocation21_spill]]  ;;  %s1662_s21 = smov %s1181_s22 }
  0xc0   : > { %s1664_s24 = smov %s1193_s25 }
  0xc1   :  { %28 = sbr.rel (!%p26_p2) target bundleno = 15 (0xf), region = 151 }
  0xc3   : > { %s1663_s22 = smov %s1659_s15 }
  0xc5   : > { %s1665_s25 = smov %s1661_s19 }
  0xc6   :  { %641 = vsyncpa [#allocation3], 1 }
  0xc7   :  { %643 = vsyncpa [#allocation3 + $0x1], 1 }
  0xc8   :  { %644 = vsyncpa [#allocation6], 1 }
  0xc9   :  { %646 = vsyncpa [#allocation6 + $0x1], 1 }
  0xca   :  { %647 = vsyncpa [#allocation9], 1 }
  0xcb   :  { %649 = vsyncpa [#allocation9 + $0x1], 1 }
  0xcc   :  { %650 = vsyncpa [#allocation4], 1 }
  0xcd   :  { %652 = vsyncpa [#allocation4 + $0x1], 1 }

</bundles_post_ra>
